<compile_context>
chip_gen: v7x
topology: tpu7x:2x2x1
jax: 0.10.0
libtpu: 0.0.40
codegen_flags: <defaults>
</compile_context>

<pallas_src>
import jax
import jax.numpy as jnp
from jax.experimental import pallas as pl
from jax.experimental.pallas import tpu as pltpu


def _round_up(x, m):
    return (x + m - 1) // m * m


def gru_cell_kernel(m_ref, h_ref, wih_ref, whh_ref, bias_ref, bhn_ref, out_ref):
    """One (TILE_N, Hp) tile of the GRUCell update.

    gi = m @ W_ih^T + bias      (bias = [b_ir+b_hr | b_iz+b_hz | b_in], padded)
    gh = h @ W_hh^T             (b_hn added inside the r * (.) term)
    r  = sigmoid(gi_r + gh_r); z = sigmoid(gi_z + gh_z)
    n  = tanh(gi_n + r * (gh_n + b_hn))
    h' = n + z * (h - n)        == (1 - z) * n + z * h
    """
    H = out_ref.shape[-1]  # padded hidden size, multiple of 128

    # bf16 MXU operands, f32 accumulation; gate math stays f32 (VPU/EUP).
    h_f32 = h_ref[...]
    m_bf = m_ref[...].astype(jnp.bfloat16)
    h_bf = h_f32.astype(jnp.bfloat16)

    gi = jnp.dot(m_bf, wih_ref[...], preferred_element_type=jnp.float32) + bias_ref[...]
    gh = jnp.dot(h_bf, whh_ref[...], preferred_element_type=jnp.float32)

    # Lane-aligned gate slices (H is a multiple of 128 -> vreg-boundary cuts).
    r = jax.nn.sigmoid(gi[:, 0:H] + gh[:, 0:H])
    z = jax.nn.sigmoid(gi[:, H:2 * H] + gh[:, H:2 * H])
    n = jnp.tanh(gi[:, 2 * H:3 * H] + r * (gh[:, 2 * H:3 * H] + bhn_ref[...]))

    out_ref[...] = (n + z * (h_f32 - n)).astype(out_ref.dtype)


def prepare_ggnn_params(w_ih, w_hh, b_ih, b_hh, compute_dtype=jnp.bfloat16):
    """Convert PyTorch-layout GRUCell params into kernel layout.

    w_ih: [3H, in_m], w_hh: [3H, H], b_ih/b_hh: [3H]  (gate order r, z, n)
    Returns transposed, 128-lane-padded, bf16 weights and f32 folded biases.
    """
    three_h, in_m = w_ih.shape
    H = three_h // 3
    Hp = _round_up(H, 128)
    Kp = _round_up(in_m, 128)

    def split3(a):
        return a[:H], a[H:2 * H], a[2 * H:3 * H]

    w_ir, w_iz, w_in = split3(w_ih)
    w_hr, w_hz, w_hn = split3(w_hh)
    b_ir, b_iz, b_in = split3(b_ih)
    b_hr, b_hz, b_hn = split3(b_hh)

    def pad_wt(w, rows_to):
        wt = jnp.transpose(w)  # (K, H)
        return jnp.pad(wt, ((0, rows_to - wt.shape[0]), (0, Hp - wt.shape[1])))

    wih_t = jnp.concatenate(
        [pad_wt(w_ir, Kp), pad_wt(w_iz, Kp), pad_wt(w_in, Kp)], axis=1
    ).astype(compute_dtype)
    whh_t = jnp.concatenate(
        [pad_wt(w_hr, Hp), pad_wt(w_hz, Hp), pad_wt(w_hn, Hp)], axis=1
    ).astype(compute_dtype)

    def pad_b(b):
        return jnp.pad(b.astype(jnp.float32), (0, Hp - b.shape[0]))

    # Fold b_ih + b_hh for r and z; keep b_in separate-but-folded into gi, and
    # keep b_hn on its own because it sits inside the r * (.) term.
    bias = jnp.concatenate(
        [pad_b(b_ir + b_hr), pad_b(b_iz + b_hz), pad_b(b_in)]
    ).reshape(1, 3 * Hp)
    b_hn_p = pad_b(b_hn).reshape(1, Hp)

    return {"wih_t": wih_t, "whh_t": whh_t, "bias": bias, "b_hn": b_hn_p,
            "H": H, "in_m": in_m, "Hp": Hp, "Kp": Kp}


def ggnn_update(h_v, m_v, params, tile_n=512):
    """GGNN update: h_new = GRUCell(m_v, h_v).  h_v: [N, H], m_v: [N, in_m]."""
    N, H = h_v.shape
    assert H == params["H"] and m_v.shape == (N, params["in_m"])
    Hp, Kp = params["Hp"], params["Kp"]
    wih_t, whh_t = params["wih_t"], params["whh_t"]
    bias, b_hn = params["bias"], params["b_hn"]

    # ---- Tile sizing: weights resident + double-buffered activation tiles +
    # f32 gi/gh temporaries must fit under the 32 MiB default scoped VMEM
    # (portable across v5e/v6e and v7x's 64 MiB part without raising limits). ----
    weight_bytes = (wih_t.size * wih_t.dtype.itemsize
                    + whh_t.size * whh_t.dtype.itemsize)
    per_row = (2 * 4 * (Kp + 2 * Hp)   # double-buffered f32 m/h/out tiles
               + 4 * 6 * Hp            # f32 gi/gh temporaries
               + 2 * (Kp + Hp))        # bf16 casts of the matmul operands
    budget = 24 * 1024 * 1024
    max_rows = max(8, ((budget - weight_bytes) // per_row) // 8 * 8)
    tile_n = max(8, (int(tile_n) // 8) * 8)
    TILE_N = int(min(tile_n, max_rows, _round_up(N, 8)))
    N_pad = _round_up(N, TILE_N)
    grid = (N_pad // TILE_N,)

    # Zero-pad activations; padded rows/cols produce zeros that are sliced off.
    m_pad = jnp.pad(m_v.astype(jnp.float32),
                    ((0, N_pad - N), (0, Kp - m_v.shape[1])))
    h_pad = jnp.pad(h_v.astype(jnp.float32),
                    ((0, N_pad - N), (0, Hp - H)))

    cost = pl.CostEstimate(
        flops=2 * N_pad * (Kp + Hp) * (3 * Hp),
        transcendentals=3 * N_pad * Hp,
        bytes_accessed=(4 * N_pad * (Kp + 2 * Hp)
                        + weight_bytes + 4 * (bias.size + b_hn.size)),
    )

    out_pad = pl.pallas_call(
        gru_cell_kernel,
        out_shape=jax.ShapeDtypeStruct((N_pad, Hp), jnp.float32),
        grid=grid,
        in_specs=[
            pl.BlockSpec((TILE_N, Kp), lambda i: (i, 0)),   # m tile (pipelined)
            pl.BlockSpec((TILE_N, Hp), lambda i: (i, 0)),   # h tile (pipelined)
            pl.BlockSpec((Kp, 3 * Hp), lambda i: (0, 0)),   # W_ih^T, VMEM-resident
            pl.BlockSpec((Hp, 3 * Hp), lambda i: (0, 0)),   # W_hh^T, VMEM-resident
            pl.BlockSpec((1, 3 * Hp), lambda i: (0, 0)),    # folded bias
            pl.BlockSpec((1, Hp), lambda i: (0, 0)),        # b_hn
        ],
        out_specs=pl.BlockSpec((TILE_N, Hp), lambda i: (i, 0)),
        input_output_aliases={1: 0},                        # reuse h buffer for h'
        compiler_params=pltpu.CompilerParams(
            dimension_semantics=("parallel",),              # shards N over v7x TCs
        ),
        cost_estimate=cost,
    )(m_pad, h_pad, wih_t, whh_t, bias, b_hn)

    return out_pad[:N, :H].astype(h_v.dtype)


def gru_cell_reference(h_v, m_v, w_ih, w_hh, b_ih, b_hh):
    H = h_v.shape[-1]
    gi = m_v @ w_ih.T + b_ih
    gh = h_v @ w_hh.T + b_hh
    r = jax.nn.sigmoid(gi[:, :H] + gh[:, :H])
    z = jax.nn.sigmoid(gi[:, H:2 * H] + gh[:, H:2 * H])
    n = jnp.tanh(gi[:, 2 * H:] + r * gh[:, 2 * H:])
    return (1.0 - z) * n + z * h_v


if __name__ == "__main__":
    key = jax.random.PRNGKey(0)

    def make_case(k, n_nodes, in_m, out):
        ks = jax.random.split(k, 6)
        bound = 1.0 / (out ** 0.5)   # PyTorch GRUCell init range
        h_v = jax.random.normal(ks[0], (n_nodes, out), jnp.float32)
        m_v = jax.random.normal(ks[1], (n_nodes, in_m), jnp.float32)
        w_ih = jax.random.uniform(ks[2], (3 * out, in_m), jnp.float32, -bound, bound)
        w_hh = jax.random.uniform(ks[3], (3 * out, out), jnp.float32, -bound, bound)
        b_ih = jax.random.uniform(ks[4], (3 * out,), jnp.float32, -bound, bound)
        b_hh = jax.random.uniform(ks[5], (3 * out,), jnp.float32, -bound, bound)
        return h_v, m_v, w_ih, w_hh, b_ih, b_hh

    k1, k2 = jax.random.split(key)

    # Case 1: shapes implied by the module config {'in_m': 32, 'out': 32}, 8 nodes.
    h_v, m_v, w_ih, w_hh, b_ih, b_hh = make_case(k1, 8, 32, 32)
    params = prepare_ggnn_params(w_ih, w_hh, b_ih, b_hh)
    ref = gru_cell_reference(h_v, m_v, w_ih, w_hh, b_ih, b_hh)
    h_new = jax.block_until_ready(ggnn_update(h_v, m_v, params))
    assert h_new.shape == h_v.shape and h_new.dtype == h_v.dtype
    assert jnp.allclose(h_new, ref, atol=3e-2, rtol=3e-2), \
        float(jnp.max(jnp.abs(h_new - ref)))

    # Case 2: exercises the multi-tile grid path (padding on every axis, grid > 1).
    h_v, m_v, w_ih, w_hh, b_ih, b_hh = make_case(k2, 300, 48, 96)
    params = prepare_ggnn_params(w_ih, w_hh, b_ih, b_hh)
    ref = gru_cell_reference(h_v, m_v, w_ih, w_hh, b_ih, b_hh)
    h_new = jax.block_until_ready(ggnn_update(h_v, m_v, params, tile_n=128))
    assert jnp.allclose(h_new, ref, atol=3e-2, rtol=3e-2), \
        float(jnp.max(jnp.abs(h_new - ref)))

    print("KERNEL_OK")
</pallas_src>

<mosaic_0001>
module attributes {stable_mosaic.version = 11 : i64} {
  func.func @gru_cell_kernel(%arg0: i32, %arg1: memref<8x128xf32, #tpu.memory_space<vmem>>, %arg2: memref<8x128xf32, #tpu.memory_space<vmem>>, %arg3: memref<128x384xbf16, #tpu.memory_space<vmem>>, %arg4: memref<128x384xbf16, #tpu.memory_space<vmem>>, %arg5: memref<1x384xf32, #tpu.memory_space<vmem>>, %arg6: memref<1x128xf32, #tpu.memory_space<vmem>>, %arg7: memref<8x128xf32, #tpu.memory_space<vmem>>) attributes {dimension_semantics = [#tpu.dimension_semantics<parallel>], iteration_bounds = array<i64: 1>, scalar_prefetch = 0 : i64, scratch_operands = 0 : i64, tpu.core_type = #tpu.core_type<tc>, window_params = [{transform_indices = @transform_0, window_bounds = array<i64: 8, 128>}, {transform_indices = @transform_1, window_bounds = array<i64: 8, 128>}, {pipeline_mode = #tpu.pipeline_mode<synchronous>, transform_indices = @transform_2, window_bounds = array<i64: 128, 384>}, {pipeline_mode = #tpu.pipeline_mode<synchronous>, transform_indices = @transform_3, window_bounds = array<i64: 128, 384>}, {pipeline_mode = #tpu.pipeline_mode<synchronous>, transform_indices = @transform_4, window_bounds = array<i64: 1, 384>}, {pipeline_mode = #tpu.pipeline_mode<synchronous>, transform_indices = @transform_5, window_bounds = array<i64: 1, 128>}, {transform_indices = @transform_6, window_bounds = array<i64: 8, 128>}]} {
    %c0 = arith.constant 0 : index
    %c0_0 = arith.constant 0 : index
    %0 = vector.load %arg2[%c0, %c0_0] : memref<8x128xf32, #tpu.memory_space<vmem>>, vector<8x128xf32>
    %c0_1 = arith.constant 0 : index
    %c0_2 = arith.constant 0 : index
    %1 = vector.load %arg1[%c0_1, %c0_2] : memref<8x128xf32, #tpu.memory_space<vmem>>, vector<8x128xf32>
    %2 = arith.truncf %1 : vector<8x128xf32> to vector<8x128xbf16>
    %3 = arith.truncf %0 : vector<8x128xf32> to vector<8x128xbf16>
    %c0_3 = arith.constant 0 : index
    %c0_4 = arith.constant 0 : index
    %4 = vector.load %arg3[%c0_3, %c0_4] : memref<128x384xbf16, #tpu.memory_space<vmem>>, vector<128x384xbf16>
    %cst = arith.constant dense<0.000000e+00> : vector<8x384xf32>
    %5 = tpu.matmul %2, %4, %cst {dimension_numbers = #tpu.dot_dimension_numbers<[1], [0], [0], [1], [0, 0, 1, 1], [], []>} : vector<8x128xbf16>, vector<128x384xbf16>, vector<8x384xf32> -> vector<8x384xf32>
    %c0_5 = arith.constant 0 : index
    %c0_6 = arith.constant 0 : index
    %6 = vector.load %arg5[%c0_5, %c0_6] : memref<1x384xf32, #tpu.memory_space<vmem>>, vector<1x384xf32>
    %7 = vector.broadcast %6 : vector<1x384xf32> to vector<8x384xf32>
    %8 = arith.addf %5, %7 : vector<8x384xf32>
    %c0_7 = arith.constant 0 : index
    %c0_8 = arith.constant 0 : index
    %9 = vector.load %arg4[%c0_7, %c0_8] : memref<128x384xbf16, #tpu.memory_space<vmem>>, vector<128x384xbf16>
    %cst_9 = arith.constant dense<0.000000e+00> : vector<8x384xf32>
    %10 = tpu.matmul %3, %9, %cst_9 {dimension_numbers = #tpu.dot_dimension_numbers<[1], [0], [0], [1], [0, 0, 1, 1], [], []>} : vector<8x128xbf16>, vector<128x384xbf16>, vector<8x384xf32> -> vector<8x384xf32>
    %11 = vector.extract_strided_slice %8 {offsets = [0, 0], sizes = [8, 128], strides = [1, 1]} : vector<8x384xf32> to vector<8x128xf32>
    %12 = vector.extract_strided_slice %10 {offsets = [0, 0], sizes = [8, 128], strides = [1, 1]} : vector<8x384xf32> to vector<8x128xf32>
    %13 = arith.addf %11, %12 : vector<8x128xf32>
    %14 = arith.negf %13 : vector<8x128xf32>
    %15 = math.exp %14 : vector<8x128xf32>
    %cst_10 = arith.constant 1.000000e+00 : f32
    %16 = vector.broadcast %cst_10 : f32 to vector<8x128xf32>
    %17 = arith.addf %16, %15 : vector<8x128xf32>
    %18 = arith.divf %16, %17 : vector<8x128xf32>
    %19 = vector.extract_strided_slice %8 {offsets = [0, 128], sizes = [8, 128], strides = [1, 1]} : vector<8x384xf32> to vector<8x128xf32>
    %20 = vector.extract_strided_slice %10 {offsets = [0, 128], sizes = [8, 128], strides = [1, 1]} : vector<8x384xf32> to vector<8x128xf32>
    %21 = arith.addf %19, %20 : vector<8x128xf32>
    %22 = arith.negf %21 : vector<8x128xf32>
    %23 = math.exp %22 : vector<8x128xf32>
    %cst_11 = arith.constant 1.000000e+00 : f32
    %24 = vector.broadcast %cst_11 : f32 to vector<8x128xf32>
    %25 = arith.addf %24, %23 : vector<8x128xf32>
    %26 = arith.divf %24, %25 : vector<8x128xf32>
    %27 = vector.extract_strided_slice %8 {offsets = [0, 256], sizes = [8, 128], strides = [1, 1]} : vector<8x384xf32> to vector<8x128xf32>
    %28 = vector.extract_strided_slice %10 {offsets = [0, 256], sizes = [8, 128], strides = [1, 1]} : vector<8x384xf32> to vector<8x128xf32>
    %c0_12 = arith.constant 0 : index
    %c0_13 = arith.constant 0 : index
    %29 = vector.load %arg6[%c0_12, %c0_13] : memref<1x128xf32, #tpu.memory_space<vmem>>, vector<1x128xf32>
    %30 = vector.broadcast %29 : vector<1x128xf32> to vector<8x128xf32>
    %31 = arith.addf %28, %30 : vector<8x128xf32>
    %32 = arith.mulf %18, %31 : vector<8x128xf32>
    %33 = arith.addf %27, %32 : vector<8x128xf32>
    %34 = math.tanh %33 : vector<8x128xf32>
    %35 = arith.subf %0, %34 : vector<8x128xf32>
    %36 = arith.mulf %26, %35 : vector<8x128xf32>
    %37 = arith.addf %34, %36 : vector<8x128xf32>
    %c0_14 = arith.constant 0 : index
    %c0_15 = arith.constant 0 : index
    %38 = vector.load %arg7[%c0_14, %c0_15] : memref<8x128xf32, #tpu.memory_space<vmem>>, vector<8x128xf32>
    tpu.vector_store %arg7[%c0_14, %c0_15], %37 {strides = array<i32>} : memref<8x128xf32, #tpu.memory_space<vmem>>, vector<8x128xf32>,
    return
  }
  func.func @transform_0(%arg0: i32) -> (i32, i32) {
    %c0_i32 = arith.constant 0 : i32
    %c0_i32_0 = arith.constant 0 : i32
    return %arg0, %c0_i32 : i32, i32
  }
  func.func @transform_1(%arg0: i32) -> (i32, i32) {
    %c0_i32 = arith.constant 0 : i32
    %c0_i32_0 = arith.constant 0 : i32
    return %arg0, %c0_i32 : i32, i32
  }
  func.func @transform_2(%arg0: i32) -> (i32, i32) {
    %c0_i32 = arith.constant 0 : i32
    %c0_i32_0 = arith.constant 0 : i32
    %c0_i32_1 = arith.constant 0 : i32
    return %c0_i32, %c0_i32_0 : i32, i32
  }
  func.func @transform_3(%arg0: i32) -> (i32, i32) {
    %c0_i32 = arith.constant 0 : i32
    %c0_i32_0 = arith.constant 0 : i32
    %c0_i32_1 = arith.constant 0 : i32
    return %c0_i32, %c0_i32_0 : i32, i32
  }
  func.func @transform_4(%arg0: i32) -> (i32, i32) {
    %c0_i32 = arith.constant 0 : i32
    %c0_i32_0 = arith.constant 0 : i32
    %c0_i32_1 = arith.constant 0 : i32
    return %c0_i32, %c0_i32_0 : i32, i32
  }
  func.func @transform_5(%arg0: i32) -> (i32, i32) {
    %c0_i32 = arith.constant 0 : i32
    %c0_i32_0 = arith.constant 0 : i32
    %c0_i32_1 = arith.constant 0 : i32
    return %c0_i32, %c0_i32_0 : i32, i32
  }
  func.func @transform_6(%arg0: i32) -> (i32, i32) {
    %c0_i32 = arith.constant 0 : i32
    %c0_i32_0 = arith.constant 0 : i32
    return %arg0, %c0_i32 : i32, i32
  }
}

</mosaic_0001>

<bundles_post_ra>
// kernel: tpu_custom_call.1
= control target key start
LH: loop header
LB: loop body
LE: loop exit
PB: predicated region body
PF: predicated region fallthrough
CT: control target
= control target key end

     0   :  { %11 = vsyncpa [#allocation3], 0  ;;  %s1033_s0 = inlined_call_operand.vmem [shape: f32[8,128], index: 0, kind: input, shape index: {}]   ;;  %s1034_s1 = inlined_call_operand.hbm [shape: f32[8,128], index: 1, kind: input, shape index: {}, may-alias: {1,6}]   ;;  %s1035_s2 = inlined_call_operand.hbm [shape: bf16[128,384], index: 2, kind: input, shape index: {}]   ;;  %s1036_s3 = inlined_call_operand.hbm [shape: bf16[128,384], index: 3, kind: input, shape index: {}]   ;;  %s1037_s4 = inlined_call_operand.vmem [shape: f32[1,384], index: 4, kind: input, shape index: {}]   ;;  %s1038_s5 = inlined_call_operand.vmem [shape: f32[1,128], index: 5, kind: input, shape index: {}]   ;;  %s1039_s6 = inlined_call_operand.hbm [shape: f32[8,128], index: 6, kind: output, shape index: {}, may-alias: {1,6}]  }
   0x1   :  { %12 = vsyncpa [#allocation6], 0 }
   0x2   :  { %13 = vsyncpa [#allocation4], 0  ;;  %s904_s21 = smov [#allocation5]   ;;  %s810_s25 = scalar_lea.hbm %s1035_s2, 3072 }
   0x3   :  { %s31_s22 = sshll.u32 %s904_s21, 4  ;;  %p811_p0 = scmp.ne.s32.totalorder %s1035_s2, %s810_s25  ;;  %s32_s22 = int_to_ptr.vmem [resolvable:$true] %s31_s22 }
   0x4   :  { %p814_p1 = scmp.lt.u32.totalorder %s810_s25, %s1035_s2 }
   0x6   :  { %p816_p2 = pnand %p814_p1, %p811_p0 }
   0x8   :  { %819 = shalt.err (!%p816_p2)
}
   0x9   :  { %s820_s30 = scalar_lea.vmem %s32_s22, 3072  ;;  %p825_p4 = scmp.lt.s32.totalorder %s32_s22, %s32_s22 }
   0xa   :  { %p821_p3 = scmp.ne.s32.totalorder %s32_s22, %s820_s30  ;;  %p826_p5 = scmp.lt.s32.totalorder %s820_s30, %s820_s30 }
   0xc   :  { %p827_p6 = por %p826_p5, %p825_p4 }
   0xe   :  { %p828_p7 = pnand %p827_p6, %p821_p3 }
  0x10   :  { %831 = shalt.err (!%p828_p7)
}
  0x11   :  { %s905_s7 = smov 192   ;;  %s906_s8 = smov 12  }
  0x12   :  { %37 = dma.hbm_to_vmem [thread:$0]  %s1035_s2, 3072, %s32_s22, [#allocation6], %s905_s7, %s905_s7, %s906_s8  }
  0x13   :  { %s907_s11 = smov [#allocation2]   ;;  %s908_s13 = smov [#allocation7]  }
  0x14   :  { %s22_s12 = sshll.u32 %s907_s11, 4  ;;  %s43_s14 = sshll.u32 %s908_s13, 4  ;;  %s23_s12 = int_to_ptr.vmem [resolvable:$true] %s22_s12  ;;  %s44_s14 = int_to_ptr.vmem [resolvable:$true] %s43_s14 }
  0x15   :  { %s832_s17 = scalar_lea.hbm %s1034_s1, 128 }
  0x16   :  { %p833_p8 = scmp.ne.s32.totalorder %s1034_s1, %s832_s17  ;;  %p836_p9 = scmp.lt.u32.totalorder %s832_s17, %s1034_s1 }
  0x18   :  { %p838_p10 = pnand %p836_p9, %p833_p8 }
  0x1a   :  { %841 = shalt.err (!%p838_p10)
}
  0x1b   :  { %s842_s2 = scalar_lea.vmem %s23_s12, 128  ;;  %p847_p12 = scmp.lt.s32.totalorder %s23_s12, %s23_s12 }
  0x1c   :  { %p843_p11 = scmp.ne.s32.totalorder %s23_s12, %s842_s2  ;;  %p848_p13 = scmp.lt.s32.totalorder %s842_s2, %s842_s2 }
  0x1e   :  { %p849_p0 = por %p848_p13, %p847_p12 }
  0x20   :  { %p850_p1 = pnand %p849_p0, %p843_p11 }
  0x22   :  { %853 = shalt.err (!%p850_p1)
}
  0x23   :  { %25 = dma.hbm_to_vmem [thread:$0]  %s1034_s1, 128, %s23_s12, [#allocation3]  }
  0x24   :  { %s854_s26 = scalar_lea.hbm %s1036_s3, 3072 }
  0x25   :  { %p855_p2 = scmp.ne.s32.totalorder %s1036_s3, %s854_s26  ;;  %p858_p3 = scmp.lt.u32.totalorder %s854_s26, %s1036_s3 }
  0x27   :  { %p860_p4 = pnand %p858_p3, %p855_p2 }
  0x29   :  { %863 = shalt.err (!%p860_p4)
}
  0x2a   :  { %s864_s9 = scalar_lea.vmem %s44_s14, 3072  ;;  %p869_p6 = scmp.lt.s32.totalorder %s44_s14, %s44_s14 }
  0x2b   :  { %p865_p5 = scmp.ne.s32.totalorder %s44_s14, %s864_s9  ;;  %p870_p7 = scmp.lt.s32.totalorder %s864_s9, %s864_s9 }
  0x2d   :  { %p871_p8 = por %p870_p7, %p869_p6 }
  0x2f   :  { %p872_p9 = pnand %p871_p8, %p865_p5 }
  0x31   :  { %875 = shalt.err (!%p872_p9)
}
  0x32   :  { %49 = dma.hbm_to_vmem [thread:$0]  %s1036_s3, 3072, %s44_s14, [#allocation6], %s905_s7, %s905_s7, %s906_s8  }
  0x33   :  { %898 = dma.done.wait [#allocation3], 128  }
  0x34   :  { %899 = vsyncadd [#allocation3], 4294967168 }
  0x35   :  { %900 = dma.done.wait [#allocation6], 6144  }
  0x36   :  { %901 = vsyncadd [#allocation6], 4294961152  ;;  %v909_v0 = vmov 0.0   ;;  %v910_v1 = vmov 0   ;;  %vm911_vm0 = vmmov 0   ;;  %v65_v23 = vld [vmem:[%s1033_s0] sm:$0xff]  ;;  %v102_v58 = vlaneseq }
  0x37   :  { %681 = vmatprep.subr.bf16.mxu1 %v909_v0  ;;  %277 = vmatprep.mubr.bf16.mxu0 %v910_v1  ;;  %v736_v2 = vld [vmem:[#allocation5 + $0x4] ss:$12 sps:$4 sm:$0xff]   ;;  %v738_v3 = vld [vmem:[#allocation5] ss:$12 sps:$4 sm:$0xff]   ;;  %v739_v4 = vld [vmem:[#allocation5 + $0x1c] ss:$12 sps:$4 sm:$0xff]   ;;  %v66_v26 = vpack.c.bf16 %v65_v23, %v65_v23 }
  0x38   :  { %697 = vmatprep.mubr.msk.bf16.mxu1 %vm911_vm0, %v909_v0  ;;  %245 = vmatprep.subr.bf16.mxu0 %v736_v2  ;;  %v741_v5 = vld [vmem:[#allocation5 + $0x18] ss:$12 sps:$4 sm:$0xff]   ;;  %v742_v6 = vld [vmem:[#allocation5 + $0x34] ss:$12 sps:$4 sm:$0xff]   ;;  %v744_v7 = vld [vmem:[#allocation5 + $0x30] ss:$12 sps:$4 sm:$0xff]  }
  0x39   :  { %246 = vmatpush1.bf16.msra.mxu0 %v738_v3  ;;  %v745_v8 = vld [vmem:[#allocation5 + $0x4c] ss:$12 sps:$4 sm:$0xff]   ;;  %v756_v9 = vld [vmem:[#allocation5 + $0x8] ss:$12 sps:$4 sm:$0xff]   ;;  %v748_v11 = vld [vmem:[#allocation5 + $0x64] ss:$12 sps:$4 sm:$0xff]  }
  0x3a   :  { %247 = vmatprep.subr.bf16.mxu0 %v739_v4  ;;  %v747_v10 = vld [vmem:[#allocation5 + $0x48] ss:$12 sps:$4 sm:$0xff]   ;;  %682 = vmatpush3.bf16.msra.mxu1 %v756_v9  ;;  %v760_v12 = vld [vmem:[#allocation5 + $0x20] ss:$12 sps:$4 sm:$0xff]   ;;  %v762_v14 = vld [vmem:[#allocation5 + $0x38] ss:$12 sps:$4 sm:$0xff]  }
  0x3b   :  { %683 = vmatprep.subr.bf16.mxu1 %v909_v0  ;;  %v750_v13 = vld [vmem:[#allocation5 + $0x60] ss:$12 sps:$4 sm:$0xff]   ;;  %v751_v15 = vld [vmem:[#allocation5 + $0x7c] ss:$12 sps:$4 sm:$0xff]   ;;  %v753_v16 = vld [vmem:[#allocation5 + $0x78] ss:$12 sps:$4 sm:$0xff]  }
  0x3c   :  { %v766_v17 = vld [vmem:[#allocation5 + $0x50] ss:$12 sps:$4 sm:$0xff]   ;;  %v754_v18 = vld [vmem:[#allocation5 + $0x94] ss:$12 sps:$4 sm:$0xff]   ;;  %v758_v21 = vld [vmem:[#allocation5 + $0xac] ss:$12 sps:$4 sm:$0xff]  }
  0x3d   :  { %248 = vmatpush1.bf16.msra.mxu0 %v741_v5  ;;  %v757_v19 = vld [vmem:[#allocation5 + $0x90] ss:$12 sps:$4 sm:$0xff]   ;;  %v770_v20 = vld [vmem:[#allocation5 + $0x68] ss:$12 sps:$4 sm:$0xff]   ;;  %v774_v24 = vld [vmem:[#allocation5 + $0x80] ss:$12 sps:$4 sm:$0xff]  }
  0x3e   :  { %249 = vmatprep.subr.bf16.mxu0 %v742_v6  ;;  %684 = vmatpush3.bf16.msra.mxu1 %v760_v12  ;;  %v761_v22 = vld [vmem:[#allocation5 + $0xa8] ss:$12 sps:$4 sm:$0xff]   ;;  %v765_v25 = vld [vmem:[#allocation7 + $0x4] ss:$12 sps:$4 sm:$0xff]   ;;  %v763_v27 = vld [vmem:[#allocation7] ss:$12 sps:$4 sm:$0xff]  }
  0x3f   :  { %685 = vmatprep.subr.bf16.mxu1 %v909_v0  ;;  %v778_v28 = vld [vmem:[#allocation5 + $0x98] ss:$12 sps:$4 sm:$0xff]   ;;  %v769_v29 = vld [vmem:[#allocation7 + $0x1c] ss:$12 sps:$4 sm:$0xff]   ;;  %v773_v32 = vld [vmem:[#allocation7 + $0x34] ss:$12 sps:$4 sm:$0xff]  }
  0x40   :  { %v767_v30 = vld [vmem:[#allocation7 + $0x18] ss:$12 sps:$4 sm:$0xff]   ;;  %v782_v31 = vld [vmem:[#allocation5 + $0xb0] ss:$12 sps:$4 sm:$0xff]   ;;  %v789_v34 = vld [vmem:[#allocation7 + $0x8] ss:$12 sps:$4 sm:$0xff]  }
  0x41   :  { %250 = vmatpush1.bf16.msra.mxu0 %v744_v7  ;;  %v771_v33 = vld [vmem:[#allocation7 + $0x30] ss:$12 sps:$4 sm:$0xff]   ;;  %v777_v35 = vld [vmem:[#allocation7 + $0x4c] ss:$12 sps:$4 sm:$0xff]   ;;  %v775_v36 = vld [vmem:[#allocation7 + $0x48] ss:$12 sps:$4 sm:$0xff]  }
  0x42   :  { %251 = vmatprep.subr.bf16.mxu0 %v745_v8  ;;  %686 = vmatpush3.bf16.msra.mxu1 %v762_v14  ;;  %v793_v37 = vld [vmem:[#allocation7 + $0x20] ss:$12 sps:$4 sm:$0xff]   ;;  %v781_v38 = vld [vmem:[#allocation7 + $0x64] ss:$12 sps:$4 sm:$0xff]   ;;  %v785_v41 = vld [vmem:[#allocation7 + $0x7c] ss:$12 sps:$4 sm:$0xff]  }
  0x43   :  { %687 = vmatprep.subr.bf16.mxu1 %v909_v0  ;;  %v779_v39 = vld [vmem:[#allocation7 + $0x60] ss:$12 sps:$4 sm:$0xff]   ;;  %v794_v40 = vld [vmem:[#allocation7 + $0x38] ss:$12 sps:$4 sm:$0xff]   ;;  %v795_v43 = vld [vmem:[#allocation7 + $0x50] ss:$12 sps:$4 sm:$0xff]  }
  0x44   :  { %v783_v42 = vld [vmem:[#allocation7 + $0x78] ss:$12 sps:$4 sm:$0xff]   ;;  %v788_v44 = vld [vmem:[#allocation7 + $0x94] ss:$12 sps:$4 sm:$0xff]   ;;  %v786_v45 = vld [vmem:[#allocation7 + $0x90] ss:$12 sps:$4 sm:$0xff]  }
  0x45   :  { %252 = vmatpush1.bf16.msra.mxu0 %v747_v10  ;;  %v796_v46 = vld [vmem:[#allocation7 + $0x68] ss:$12 sps:$4 sm:$0xff]   ;;  %v792_v47 = vld [vmem:[#allocation7 + $0xac] ss:$12 sps:$4 sm:$0xff]   ;;  %v799_v53 = vld [vmem:[#allocation7 + $0xb0] ss:$12 sps:$4 sm:$0xff]  }
  0x46   :  { %253 = vmatprep.subr.bf16.mxu0 %v748_v11  ;;  %688 = vmatpush3.bf16.msra.mxu1 %v766_v17  ;;  %v790_v48 = vld [vmem:[#allocation7 + $0xa8] ss:$12 sps:$4 sm:$0xff]   ;;  %v64_v49 = vld [vmem:[#allocation2] sm:$0xff]  ;;  %v797_v50 = vld [vmem:[#allocation7 + $0x80] ss:$12 sps:$4 sm:$0xff]   ;;  %v103_v59 = vshrl.u32 %v102_v58, 7 }
  0x47   :  { %689 = vmatprep.subr.bf16.mxu1 %v909_v0  ;;  %v67_v51 = vpack.c.bf16 %v64_v49, %v64_v49  ;;  %v798_v52 = vld [vmem:[#allocation7 + $0x98] ss:$12 sps:$4 sm:$0xff]   ;;  %s912_s12 = smov [#allocation8]  }
  0x48   :  { %v104_v60 = vsub.s32 0, %v103_v59  ;;  %v100_v61 = vld [vmem:[%s1037_s4] sm:$0x7]  ;;  %v108_v2 = vsub.s32 1, %v103_v59  ;;  %s602_s13 = sshll.u32 %s912_s12, 4  ;;  %s603_s13 = int_to_ptr.vmem [resolvable:$true] %s602_s13 }
  0x49   :  { %254 = vmatpush1.bf16.msra.mxu0 %v750_v13  ;;  %p881_p11 = scmp.lt.s32.totalorder %s603_s13, %s603_s13 }
  0x4a   :  { %255 = vmatprep.subr.bf16.mxu0 %v751_v15  ;;  %690 = vmatpush3.bf16.msra.mxu1 %v770_v20  ;;  %v105_v62 = vrot.slane %v100_v61, %v104_v60  ;;  %v109_v6 = vrot.slane %v100_v61, %v108_v2  ;;  %v112_v15 = vsub.s32 2, %v103_v59 }
  0x4b   :  { %691 = vmatprep.subr.bf16.mxu1 %v909_v0 }
  0x4c   :  { %v113_v17 = vrot.slane %v100_v61, %v112_v15 }
  0x4d   :  { %256 = vmatpush1.bf16.msra.mxu0 %v753_v16  ;;  %v662_v16 = vld [vmem:[%s1038_s5] ss:$0 sm:$0xff]  ;;  %s876_s5 = scalar_lea.vmem %s603_s13, 128 }
  0x4e   :  { %257 = vmatprep.subr.bf16.mxu0 %v754_v18  ;;  %692 = vmatpush3.bf16.msra.mxu1 %v774_v24  ;;  %p877_p10 = scmp.ne.s32.totalorder %s603_s13, %s876_s5  ;;  %p882_p12 = scmp.lt.s32.totalorder %s876_s5, %s876_s5 }
  0x4f   :  { %693 = vmatprep.subr.bf16.mxu1 %v909_v0 }
  0x50   :  { %p883_p13 = por %p882_p12, %p881_p11 }
  0x51   :  { %258 = vmatpush1.bf16.msra.mxu0 %v757_v19 }
  0x52   :  { %259 = vmatprep.subr.bf16.mxu0 %v758_v21  ;;  %694 = vmatpush3.bf16.msra.mxu1 %v778_v28  ;;  %p884_p0 = pnand %p883_p13, %p877_p10 }
  0x53   :  { %695 = vmatprep.subr.bf16.mxu1 %v909_v0 }
  0x55   :  { %260 = vmatpush1.bf16.msra.mxu0 %v761_v22 }
  0x56   :  { %486 = vmatprep.subr.bf16.mxu0 %v765_v25  ;;  %696 = vmatpush3.bf16.msra.mxu1 %v782_v31 }
  0x57   :  { %701 = vmatprep.subr.bf16.mxu1 %v909_v0 }
  0x58   :  { %278 = vmatmul.mubr.bf16.vlgmr.msra.gmra.mrb[0].mxu0 %v66_v26 }
  0x59   :  { %487 = vmatpush1.bf16.msra.mxu0 %v763_v27  ;;  %518 = vmatprep.mubr.bf16.mxu0 %v910_v1 }
  0x5a   :  { %488 = vmatprep.subr.bf16.mxu0 %v769_v29  ;;  %698 = vmatmul.mubr.bf16.vlgmr.msra.gmra.mrb[0].mxu1 %v66_v26 }
  0x5b   :  { %702 = vmatpush3.bf16.msra.mxu1 %v789_v34  ;;  %717 = vmatprep.mubr.msk.bf16.mxu1 %vm911_vm0, %v909_v0 }
  0x5c   :  { %703 = vmatprep.subr.bf16.mxu1 %v909_v0 }
  0x5d   :  { %489 = vmatpush1.bf16.msra.mxu0 %v767_v30 }
  0x5e   :  { %490 = vmatprep.subr.bf16.mxu0 %v773_v32 }
  0x5f   :  { %704 = vmatpush3.bf16.msra.mxu1 %v793_v37 }
  0x60   :  { %705 = vmatprep.subr.bf16.mxu1 %v909_v0 }
  0x61   :  { %491 = vmatpush1.bf16.msra.mxu0 %v771_v33 }
  0x62   :  { %492 = vmatprep.subr.bf16.mxu0 %v777_v35 }
  0x63   :  { %706 = vmatpush3.bf16.msra.mxu1 %v794_v40 }
  0x64   :  { %707 = vmatprep.subr.bf16.mxu1 %v909_v0 }
  0x65   :  { %493 = vmatpush1.bf16.msra.mxu0 %v775_v36 }
  0x66   :  { %494 = vmatprep.subr.bf16.mxu0 %v781_v38 }
  0x67   :  { %708 = vmatpush3.bf16.msra.mxu1 %v795_v43 }
  0x68   :  { %709 = vmatprep.subr.bf16.mxu1 %v909_v0 }
  0x69   :  { %495 = vmatpush1.bf16.msra.mxu0 %v779_v39 }
  0x6a   :  { %496 = vmatprep.subr.bf16.mxu0 %v785_v41 }
  0x6b   :  { %710 = vmatpush3.bf16.msra.mxu1 %v796_v46 }
  0x6c   :  { %711 = vmatprep.subr.bf16.mxu1 %v909_v0 }
  0x6d   :  { %497 = vmatpush1.bf16.msra.mxu0 %v783_v42 }
  0x6e   :  { %498 = vmatprep.subr.bf16.mxu0 %v788_v44 }
  0x6f   :  { %712 = vmatpush3.bf16.msra.mxu1 %v797_v50 }
  0x70   :  { %713 = vmatprep.subr.bf16.mxu1 %v909_v0 }
  0x71   :  { %499 = vmatpush1.bf16.msra.mxu0 %v786_v45 }
  0x72   :  { %500 = vmatprep.subr.bf16.mxu0 %v792_v47 }
  0x73   :  { %714 = vmatpush3.bf16.msra.mxu1 %v798_v52 }
  0x74   :  { %715 = vmatprep.subr.bf16.mxu1 %v909_v0 }
  0x75   :  { %501 = vmatpush1.bf16.msra.mxu0 %v790_v48 }
  0x77   :  { %716 = vmatpush3.bf16.msra.mxu1 %v799_v53 }
  0x78   :  { %519 = vmatmul.mubr.bf16.vlgmr.msra.gmra.mrb[0].mxu0 %v67_v51 }
  0x7a   :  { %718 = vmatmul.mubr.bf16.vlgmr.msra.gmra.mrb[4].mxu1 %v67_v51 }
 0x12d   :  { %v320_v54 = vpop.f32.mrb[0].mxu1 }
 0x12e   :  { %v699_v55 = vpop.f32.mrb[1].mxu1  ;;  %v321_v21 = vadd.f32 %v320_v54, %v113_v17 }
 0x12f   :  { %v323_v56 = vpop.f32.mrb[2].mxu1 }
 0x130   :  { %v700_v57 = vpop.f32.mrb[3].mxu1 }
 0x14b   :  { %v520_v63 = vpop.f32.mrb[0].mxu0 }
 0x14c   :  { %v721_v1 = vadd.f32 %v520_v63, %v105_v62  ;;  %v522_v3 = vpop.f32.mrb[1].mxu0 }
 0x14d   :  { %v524_v4 = vpop.f32.mrb[2].mxu0  ;;  %v561_v7 = vpop.f32.mrb[4].mxu1  ;;  %v722_v8 = vadd.f32 %v522_v3, %v109_v6 }
 0x14e   :  { %v660_v0 = vmul.f32 -1.442695, %v721_v1  ;;  %v525_v5 = vpop.f32.mrb[3].mxu0  ;;  %v719_v9 = vpop.f32.mrb[5].mxu1  ;;  %v588_v18 = vadd.f32 %v662_v16, %v561_v7 }
 0x14f   :  { %v564_v10 = vpop.f32.mrb[6].mxu1  ;;  %v661_v12 = vmul.f32 -1.442695, %v722_v8 }
 0x150   :  { %800 = vpow2.f32 %v660_v0  ;;  %v720_v11 = vpop.f32.mrb[7].mxu1 }
 0x151   :  { %802 = vpow2.f32 %v661_v12 }
 0x15a   :  { %v801_v13 = vpop.eup %800 }
 0x15b   :  { %v571_v14 = vadd.f32 1.0, %v801_v13  ;;  %v803_v19 = vpop.eup %802 }
 0x15c   :  { %v578_v23 = vadd.f32 1.0, %v803_v19 }
 0x15d   :  { %804 = vrcp.f32 %v571_v14 }
 0x167   :  { %v805_v20 = vpop.eup %804 }
 0x168   :  { %v589_v22 = vmul.f32 %v805_v20, %v588_v18 }
 0x16a   :  { %v590_v24 = vadd.f32 %v589_v22, %v321_v21 }
 0x16c   :  { %806 = vtanh.f32 %v590_v24 }
 0x16d   :  { %808 = vrcp.f32 %v578_v23 }
 0x176   :  { %v807_v25 = vpop.eup %806 }
 0x177   :  { %v592_v26 = vsub.f32 %v64_v49, %v807_v25  ;;  %v809_v27 = vpop.eup %808 }
 0x179   :  { %v593_v28 = vmul.f32 %v809_v27, %v592_v26 }
 0x17b   :  { %v594_v29 = vadd.f32 %v807_v25, %v593_v28 }
 0x17d   :  { %595 = vst [vmem:[#allocation8] sm:$0xff] %v594_v29 }
 0x17e   :  { %887 = shalt.err (!%p884_p0)
}
 0x17f   :  { %s888_s16 = scalar_lea.hbm %s1039_s6, 128 }
 0x180   :  { %p889_p1 = scmp.ne.s32.totalorder %s1039_s6, %s888_s16  ;;  %p892_p2 = scmp.lt.u32.totalorder %s888_s16, %s1039_s6 }
 0x182   :  { %p894_p3 = pnand %p892_p2, %p889_p1 }
 0x184   :  { %897 = shalt.err (!%p894_p3)
}
 0x185   :  { %605 = dma.vmem_to_hbm [thread:$0]  %s603_s13, 128, %s1039_s6, [#allocation4]  }
 0x186   :  { %902 = dma.done.wait [#allocation4], 128  }
 0x187   :  { %903 = vsyncadd [#allocation4], 4294967168 }
 0x188   :  { %609 = vsyncpa [#allocation3], 1 }
 0x189   :  { %610 = vsyncpa [#allocation6], 1 }
 0x18a   :  { %611 = vsyncpa [#allocation4], 1 }

</bundles_post_ra>
